<compile_context>
chip_gen: v7x
topology: tpu7x:2x2x1
jax: 0.10.0
libtpu: 0.0.40
codegen_flags: <defaults>
</compile_context>

<pallas_src>
import functools

import jax
import jax.numpy as jnp
from jax.experimental import pallas as pl
from jax.experimental.pallas import tpu as pltpu

NUM_CLASSES = 8  # module relies on a global NUM_CLASSES; fixed deterministically here


def _round_up(x: int, m: int) -> int:
    return ((x + m - 1) // m) * m


def _cdiv(a: int, b: int) -> int:
    return (a + b - 1) // b


def _condor_loss_kernel(logits_ref, labels_ref, out_ref, *, n, bn, g_inner):
    # logits_ref: (K-1, bn) native dtype, labels_ref: (1, bn) int32, out_ref: (1,128) f32
    i = pl.program_id(1)

    @pl.when(i == 0)
    def _init():
        out_ref[...] = jnp.zeros_like(out_ref)

    logits = logits_ref[...].astype(jnp.float32)    # in-kernel cast (free VPU op)
    labels = labels_ref[...]                         # (1, bn) int32
    k1 = logits.shape[0]

    # (K-1, 1) threshold iota; broadcasts against (1, bn) labels inside the compares.
    k_idx = jax.lax.broadcasted_iota(jnp.int32, (k1, 1), 0)
    levels = k_idx < labels        # labels[i] > k
    aux = k_idx <= labels          # == concat([ones, levels[:, :-1]]) for labels >= 0

    # Ragged-tail validity mask (replaces wrapper-side padding): logical column < n.
    block_idx = pl.program_id(0) * g_inner + i
    col = block_idx * bn + jax.lax.broadcasted_iota(jnp.int32, (1, bn), 1)
    valid = col < n

    # logsigmoid(x) = min(x, 0) - log1p(exp(-|x|));  log(1 - sigmoid(x)) = logsig(x) - x.
    logsig = jnp.minimum(logits, 0.0) - jnp.log1p(jnp.exp(-jnp.abs(logits)))
    inner = jnp.where(levels, logsig, logsig - logits)
    # Select (not multiply) so garbage in the ragged tail never propagates (NaN-safe).
    term = jnp.where(aux & valid, inner, 0.0)

    # Accumulate this block's partial of -sum(term) into the resident output block.
    out_ref[...] += jnp.broadcast_to(-jnp.sum(term), out_ref.shape)


def condor_loss(logits, labels, *, block_n=65536):
    """logits: (N, NUM_CLASSES-1) float (any dtype), labels: (N,) int. Returns scalar f32."""
    n, k1 = logits.shape

    # Lane-dense layout: batch on the lane (last) axis; transpose stays in native dtype.
    logits_t = logits.T                                    # (K-1, N)
    labels_row = labels.astype(jnp.int32).reshape(1, n)    # (1, N)

    # Block sizing: large lane tiles amortize per-step overhead; cap at half of N so the
    # grid has >= 2 blocks whenever possible (keeps both v7x TensorCores busy) while
    # 2x(logits+labels) double-buffers remain a few MB at most.
    bn = max(128, min(_round_up(block_n, 128), _round_up(_cdiv(n, 2), 128)))
    g_blocks = _cdiv(n, bn)
    n_cores = 2 if g_blocks >= 2 else 1
    g_inner = _cdiv(g_blocks, n_cores)

    def block_col(c, i):
        # At most one overshoot block (odd g_blocks): clamp it onto the last real block;
        # its contribution is zeroed by the in-kernel validity mask.
        return jnp.minimum(c * g_inner + i, g_blocks - 1)

    dtype_bytes = jnp.dtype(logits.dtype).itemsize
    cost = pl.CostEstimate(
        flops=12 * k1 * n,
        transcendentals=2 * k1 * n,
        bytes_accessed=n * (k1 * dtype_bytes + 4) + n_cores * 128 * 4,
    )

    kernel = functools.partial(_condor_loss_kernel, n=n, bn=bn, g_inner=g_inner)

    partials = pl.pallas_call(
        kernel,
        out_shape=jax.ShapeDtypeStruct((1, n_cores * 128), jnp.float32),
        grid=(n_cores, g_inner),
        in_specs=[
            pl.BlockSpec((k1, bn), lambda c, i: (0, block_col(c, i))),   # logits tile
            pl.BlockSpec((1, bn), lambda c, i: (0, block_col(c, i))),    # labels row
        ],
        # One lane-dense (1,128) accumulator block per core, resident across the
        # inner (reduction) axis.
        out_specs=pl.BlockSpec((1, 128), lambda c, i: (0, c)),
        compiler_params=pltpu.CompilerParams(
            dimension_semantics=("parallel", "arbitrary")),
        cost_estimate=cost,
    )(logits_t, labels_row)

    # Tiny epilogue: one partial per core (lane 0 of each 128-lane segment).
    per_core = partials.reshape(n_cores, 128)[:, 0]
    return jnp.sum(per_core) / jnp.float32(n)


def _ref_condor_loss(logits, labels, num_classes):
    """Pure-JAX reference mirroring condor_pytorch exactly."""
    k = jnp.arange(num_classes - 1)
    levels = (labels[:, None] > k[None, :]).astype(jnp.float32)
    aux = jnp.concatenate(
        [jnp.ones((labels.shape[0], 1), jnp.float32), levels[:, :-1]], axis=1
    )
    logsig = jax.nn.log_sigmoid(logits.astype(jnp.float32))
    term = (logsig * levels + (logsig - logits.astype(jnp.float32)) * (1.0 - levels)) * aux
    return jnp.mean(-jnp.sum(term, axis=1))


if __name__ == "__main__":
    key = jax.random.PRNGKey(0)
    k_logits, k_labels = jax.random.split(key)

    # Test 1: small f32 batch, single ragged block (8 valid lanes of a 128-lane tile).
    N1 = 8
    logits1 = jax.random.normal(k_logits, (N1, NUM_CLASSES - 1), dtype=jnp.float32)
    labels1 = jax.random.randint(k_labels, (N1,), 0, NUM_CLASSES, dtype=jnp.int32)
    loss1 = jax.block_until_ready(condor_loss(logits1, labels1))
    ref1 = jax.block_until_ready(_ref_condor_loss(logits1, labels1, NUM_CLASSES))
    assert jnp.allclose(loss1, ref1, rtol=1e-5, atol=1e-5), (loss1, ref1)

    # Test 2: bf16 logits (native-dtype pass-through, in-kernel f32 cast),
    # non-multiple batch, 2-wide parallel grid (megacore path), ragged last block.
    N2 = 300
    logits2 = jax.random.normal(
        k_logits, (N2, NUM_CLASSES - 1), dtype=jnp.float32).astype(jnp.bfloat16)
    labels2 = jax.random.randint(k_labels, (N2,), 0, NUM_CLASSES, dtype=jnp.int32)
    loss2 = jax.block_until_ready(condor_loss(logits2, labels2))
    ref2 = jax.block_until_ready(_ref_condor_loss(logits2, labels2, NUM_CLASSES))
    assert jnp.allclose(loss2, ref2, rtol=1e-4, atol=1e-4), (loss2, ref2)

    # Test 3: odd block count (5 blocks -> 2 cores x 3 inner steps, one clamped
    # overshoot block) exercising in-kernel accumulation + validity masking.
    N3 = 520
    logits3 = jax.random.normal(k_logits, (N3, NUM_CLASSES - 1), dtype=jnp.float32)
    labels3 = jax.random.randint(k_labels, (N3,), 0, NUM_CLASSES, dtype=jnp.int32)
    loss3 = jax.block_until_ready(condor_loss(logits3, labels3, block_n=128))
    ref3 = jax.block_until_ready(_ref_condor_loss(logits3, labels3, NUM_CLASSES))
    assert jnp.allclose(loss3, ref3, rtol=1e-5, atol=1e-5), (loss3, ref3)

    print("KERNEL_OK")
</pallas_src>

<mosaic_0001>
module attributes {stable_mosaic.version = 11 : i64} {
  func.func @_condor_loss_kernel(%arg0: i32, %arg1: i32, %arg2: memref<7x128xf32, #tpu.memory_space<vmem>>, %arg3: memref<1x128xi32, #tpu.memory_space<vmem>>, %arg4: memref<1x128xf32, #tpu.memory_space<vmem>>) attributes {dimension_semantics = [#tpu.dimension_semantics<parallel>, #tpu.dimension_semantics<arbitrary>], iteration_bounds = array<i64: 1, 1>, scalar_prefetch = 0 : i64, scratch_operands = 0 : i64, tpu.core_type = #tpu.core_type<tc>, window_params = [{transform_indices = @transform_0, window_bounds = array<i64: 7, 128>}, {transform_indices = @transform_1, window_bounds = array<i64: 1, 128>}, {transform_indices = @transform_2, window_bounds = array<i64: 1, 128>}]} {
    %c0_i32 = arith.constant 0 : i32
    %0 = arith.cmpi eq, %arg1, %c0_i32 : i32
    %1 = arith.extui %0 : i1 to i32
    %c0_i32_0 = arith.constant 0 : i32
    %2 = arith.cmpi ne, %1, %c0_i32_0 : i32
    scf.if %2 {
      %cst_12 = arith.constant 0.000000e+00 : f32
      %43 = vector.broadcast %cst_12 : f32 to vector<1x128xf32>
      %c0_13 = arith.constant 0 : index
      %c0_14 = arith.constant 0 : index
      %44 = vector.load %arg4[%c0_13, %c0_14] : memref<1x128xf32, #tpu.memory_space<vmem>>, vector<1x128xf32>
      tpu.vector_store %arg4[%c0_13, %c0_14], %43 {strides = array<i32>} : memref<1x128xf32, #tpu.memory_space<vmem>>, vector<1x128xf32>,
    } else {
    }
    %c0 = arith.constant 0 : index
    %c0_1 = arith.constant 0 : index
    %3 = vector.load %arg2[%c0, %c0_1] : memref<7x128xf32, #tpu.memory_space<vmem>>, vector<7x128xf32>
    %c0_2 = arith.constant 0 : index
    %c0_3 = arith.constant 0 : index
    %4 = vector.load %arg3[%c0_2, %c0_3] : memref<1x128xi32, #tpu.memory_space<vmem>>, vector<1x128xi32>
    %5 = tpu.iota {dimensions = array<i32: 0>} : vector<7x1xi32>
    %6 = vector.broadcast %5 : vector<7x1xi32> to vector<7x128xi32>
    %7 = vector.broadcast %4 : vector<1x128xi32> to vector<7x128xi32>
    %8 = arith.cmpi slt, %6, %7 : vector<7x128xi32>
    %9 = vector.broadcast %5 : vector<7x1xi32> to vector<7x128xi32>
    %10 = vector.broadcast %4 : vector<1x128xi32> to vector<7x128xi32>
    %11 = arith.cmpi sle, %9, %10 : vector<7x128xi32>
    %c1_i32 = arith.constant 1 : i32
    %12 = arith.muli %arg0, %c1_i32 : i32
    %13 = arith.addi %12, %arg1 : i32
    %c128_i32 = arith.constant 128 : i32
    %14 = arith.muli %13, %c128_i32 : i32
    %15 = tpu.iota {dimensions = array<i32: 1>} : vector<1x128xi32>
    %16 = vector.broadcast %14 : i32 to vector<1x128xi32>
    %17 = arith.addi %16, %15 : vector<1x128xi32>
    %c8_i32 = arith.constant 8 : i32
    %18 = vector.broadcast %c8_i32 : i32 to vector<1x128xi32>
    %19 = arith.cmpi slt, %17, %18 : vector<1x128xi32>
    %cst = arith.constant 0.000000e+00 : f32
    %20 = vector.broadcast %cst : f32 to vector<7x128xf32>
    %21 = arith.minimumf %3, %20 : vector<7x128xf32>
    %22 = math.absf %3 : vector<7x128xf32>
    %cst_4 = arith.constant 0.000000e+00 : f32
    %23 = vector.broadcast %cst_4 : f32 to vector<7x128xf32>
    %24 = arith.subf %23, %22 : vector<7x128xf32>
    %25 = math.exp %24 : vector<7x128xf32>
    %26 = math.log1p %25 : vector<7x128xf32>
    %27 = arith.subf %21, %26 : vector<7x128xf32>
    %28 = arith.subf %27, %3 : vector<7x128xf32>
    %29 = arith.select %8, %27, %28 : vector<7x128xi1>, vector<7x128xf32>
    %30 = vector.broadcast %19 : vector<1x128xi1> to vector<7x128xi1>
    %31 = arith.andi %11, %30 : vector<7x128xi1>
    %cst_5 = arith.constant 0.000000e+00 : f32
    %32 = vector.broadcast %cst_5 : f32 to vector<7x128xf32>
    %33 = arith.select %31, %29, %32 : vector<7x128xi1>, vector<7x128xf32>
    %c0_6 = arith.constant 0 : index
    %c0_7 = arith.constant 0 : index
    %34 = vector.load %arg4[%c0_6, %c0_7] : memref<1x128xf32, #tpu.memory_space<vmem>>, vector<1x128xf32>
    %35 = vector.shape_cast %33 : vector<7x128xf32> to vector<1x7x128xf32>
    %cst_8 = arith.constant dense<0.000000e+00> : vector<1xf32>
    %36 = vector.multi_reduction <add>, %35, %cst_8 [1, 2] : vector<1x7x128xf32> to vector<1xf32>
    %37 = vector.shape_cast %36 : vector<1xf32> to vector<1x1x1xf32>
    %38 = vector.extract %37[0, 0, 0] : f32 from vector<1x1x1xf32>
    %cst_9 = arith.constant 0.000000e+00 : f32
    %39 = arith.subf %cst_9, %38 : f32
    %40 = vector.broadcast %39 : f32 to vector<1x128xf32>
    %41 = arith.addf %34, %40 : vector<1x128xf32>
    %c0_10 = arith.constant 0 : index
    %c0_11 = arith.constant 0 : index
    %42 = vector.load %arg4[%c0_10, %c0_11] : memref<1x128xf32, #tpu.memory_space<vmem>>, vector<1x128xf32>
    tpu.vector_store %arg4[%c0_10, %c0_11], %41 {strides = array<i32>} : memref<1x128xf32, #tpu.memory_space<vmem>>, vector<1x128xf32>,
    return
  }
  func.func @transform_0(%arg0: i32, %arg1: i32) -> (i32, i32) {
    %c1_i32 = arith.constant 1 : i32
    %0 = arith.muli %arg0, %c1_i32 : i32
    %1 = arith.addi %0, %arg1 : i32
    %c0_i32 = arith.constant 0 : i32
    %2 = arith.minsi %1, %c0_i32 : i32
    %c0_i32_0 = arith.constant 0 : i32
    %c0_i32_1 = arith.constant 0 : i32
    return %c0_i32_0, %2 : i32, i32
  }
  func.func @transform_1(%arg0: i32, %arg1: i32) -> (i32, i32) {
    %c1_i32 = arith.constant 1 : i32
    %0 = arith.muli %arg0, %c1_i32 : i32
    %1 = arith.addi %0, %arg1 : i32
    %c0_i32 = arith.constant 0 : i32
    %2 = arith.minsi %1, %c0_i32 : i32
    %c0_i32_0 = arith.constant 0 : i32
    %c0_i32_1 = arith.constant 0 : i32
    return %c0_i32_0, %2 : i32, i32
  }
  func.func @transform_2(%arg0: i32, %arg1: i32) -> (i32, i32) {
    %c0_i32 = arith.constant 0 : i32
    %c0_i32_0 = arith.constant 0 : i32
    return %c0_i32, %arg0 : i32, i32
  }
}

</mosaic_0001>

<bundles_post_ra>
// kernel: tpu_custom_call.1
= control target key start
LH: loop header
LB: loop body
LE: loop exit
PB: predicated region body
PF: predicated region fallthrough
CT: control target
= control target key end

     0   :  { %7 = vsyncpa [#allocation3], 0  ;;  %s238_s0 = inlined_call_operand.hbm [shape: f32[7,8], index: 0, kind: input, shape index: {}]   ;;  %s239_s1 = inlined_call_operand.vmem [shape: s32[1,8], index: 1, kind: input, shape index: {}]   ;;  %s240_s2 = inlined_call_operand.hbm [shape: f32[1,128], index: 2, kind: output, shape index: {}]  }
   0x1   :  { %8 = vsyncpa [#allocation4], 0  ;;  %s193_s9 = smov [#allocation2]   ;;  %s145_s13 = scalar_lea.hbm %s238_s0, 128 }
   0x2   :  { %s20_s10 = sshll.u32 %s193_s9, 4  ;;  %p146_p0 = scmp.ne.s32.totalorder %s238_s0, %s145_s13  ;;  %s21_s10 = int_to_ptr.vmem [resolvable:$true] %s20_s10 }
   0x3   :  { %p149_p1 = scmp.lt.u32.totalorder %s145_s13, %s238_s0 }
   0x5   :  { %p151_p2 = pnand %p149_p1, %p146_p0 }
   0x7   :  { %154 = shalt.err (!%p151_p2)
}
   0x8   :  { %s155_s18 = scalar_lea.vmem %s21_s10, 128  ;;  %p160_p4 = scmp.lt.s32.totalorder %s21_s10, %s21_s10 }
   0x9   :  { %p156_p3 = scmp.ne.s32.totalorder %s21_s10, %s155_s18  ;;  %p161_p5 = scmp.lt.s32.totalorder %s155_s18, %s155_s18 }
   0xb   :  { %p162_p6 = por %p161_p5, %p160_p4 }
   0xd   :  { %p163_p7 = pnand %p162_p6, %p156_p3 }
   0xf   :  { %166 = shalt.err (!%p163_p7)
}
  0x10   :  { %23 = dma.hbm_to_vmem [thread:$0]  %s238_s0, 128, %s21_s10, [#allocation3]  }
  0x11   :  { %189 = dma.done.wait [#allocation3], 128  }
  0x12   :  { %190 = vsyncadd [#allocation3], 4294967168  ;;  %v194_v0 = vmov 0.0   ;;  %v61_v1 = vld [vmem:[#allocation2] sm:$0x7f]  ;;  %v63_v8 = vlaneseq  ;;  %vm100_vm5 = vcmask 1046528  }
  0x13   :  { %60 = vst [vmem:[#allocation5] sm:$0x1] %v194_v0  ;;  %v79_v2 = vand.u32 2147483647, %v61_v1  ;;  %v135_v15 = vld [vmem:[%s239_s1] ss:$0 sm:$0xff] }
  0x14   :  { %v64_v11 = vshrl.u32 %v63_v8, 7  ;;  %v74_v12 = vand.u32 127, %v63_v8  ;;  %v78_v16 = vmin.f32 %v61_v1, 0.0  ;;  %s195_s23 = smov [#allocation5]  }
  0x15   :  { %v80_v3 = vsub.f32 0.0, %v79_v2  ;;  %s121_s24 = sshll.u32 %s195_s23, 4  ;;  %s122_s24 = int_to_ptr.vmem [resolvable:$true] %s121_s24 }
  0x16   :  { %vm70_vm1 = vcmp.le.s32.totalorder %v64_v11, %v135_v15  ;;  %vm77_vm2 = vcmp.lt.s32.totalorder %v74_v12, 8  ;;  %vm69_vm3 = vcmp.lt.s32.totalorder %v64_v11, %v135_v15  ;;  %s167_s25 = scalar_lea.vmem %s122_s24, 16  ;;  %s171_s26 = scalar_lea.vmem %s122_s24, 32 }
  0x17   :  { %v81_v4 = vmul.f32 1.442695, %v80_v3  ;;  %vm97_vm4 = vmand %vm70_vm1, %vm77_vm2  ;;  %p168_p8 = scmp.ne.s32.totalorder %s122_s24, %s167_s25  ;;  %p172_p9 = scmp.lt.s32.totalorder %s122_s24, %s122_s24 }
  0x18   :  { %p173_p10 = scmp.lt.s32.totalorder %s171_s26, %s167_s25 }
  0x19   :  { %141 = vpow2.f32 %v81_v4 }
  0x1a   :  { %v99_v31 = vld [vmem:[#allocation5] sm:$0x1]  ;;  %p174_p11 = por %p173_p10, %p172_p9 }
  0x1c   :  { %p175_p12 = pnand %p174_p11, %p168_p8 }
  0x23   :  { %v142_v5 = vpop.eup %141 }
  0x24   :  { %v83_v6 = vadd.f32 1.0, %v142_v5  ;;  %v86_v7 = vmul.f32 -0.5, %v142_v5  ;;  %v89_v10 = vand.u32 2147483647, %v142_v5 }
  0x26   :  { %143 = vlog2.f32 %v83_v6  ;;  %v87_v9 = vadd.f32 1.0, %v86_v7  ;;  %vm90_vm0 = vcmp.lt.f32.partialorder %v89_v10, 0.0004427343 }
  0x28   :  { %v88_v13 = vmul.f32 %v142_v5, %v87_v9 }
  0x30   :  { %v144_v14 = vpop.eup %143 }
  0x31   :  { %v85_v17 = vmul.f32 0.6931472, %v144_v14 }
  0x33   :  { %v91_v18 = vsel %vm90_vm0, %v88_v13, %v85_v17 }
  0x34   :  { %v92_v19 = vsub.f32 %v78_v16, %v91_v18 }
  0x36   :  { %v93_v20 = vsub.f32 %v92_v19, %v61_v1 }
  0x38   :  { %v94_v21 = vsel %vm69_vm3, %v92_v19, %v93_v20 }
  0x39   :  { %v98_v22 = vsel %vm97_vm4, %v94_v21, 0.0 }
  0x3a   :  { %v101_v23 = vsel %vm100_vm5, %v98_v22, 0.0 }
  0x3b   :  { %102 = vadd.xlane.f32.xlu0 %v101_v23 }
  0xc8   :  { %v103_v24 = vpop.xlane.xlu0 %102 }
  0xc9   :  { %v104_v25 = vrot.slane %v103_v24, 4 }
  0xcb   :  { %v105_v26 = vadd.f32 %v104_v25, %v103_v24 }
  0xcd   :  { %v106_v27 = vrot.slane %v105_v26, 2 }
  0xcf   :  { %v107_v28 = vadd.f32 %v106_v27, %v105_v26 }
  0xd1   :  { %v108_v29 = vrot.slane %v107_v28, 1 }
  0xd3   :  { %v109_v30 = vadd.f32 %v108_v29, %v107_v28 }
  0xd5   :  { %136 = vpush %v109_v30 }
 0x106   :  { %s137_s1 = spop %136 }
 0x107   :  { %s111_s22 = ssub.f32 0.0, %s137_s1 }
 0x109   :  { %v112_v32 = vstv %s111_s22 }
 0x10a   :  { %v113_v33 = vadd.f32 %v112_v32, %v99_v31 }
 0x10c   :  { %114 = vst [vmem:[#allocation5] sm:$0x1] %v113_v33 }
 0x10d   :  { %178 = shalt.err (!%p175_p12)
}
 0x10e   :  { %s179_s29 = scalar_lea.hbm %s240_s2, 16 }
 0x10f   :  { %p180_p13 = scmp.ne.s32.totalorder %s240_s2, %s179_s29  ;;  %p183_p0 = scmp.lt.u32.totalorder %s179_s29, %s240_s2 }
 0x111   :  { %p185_p1 = pnand %p183_p0, %p180_p13 }
 0x113   :  { %188 = shalt.err (!%p185_p1)
}
 0x114   :  { %124 = dma.vmem_to_hbm [thread:$0]  %s122_s24, 16, %s240_s2, [#allocation4]  }
 0x115   :  { %191 = dma.done.wait [#allocation4], 16  }
 0x116   :  { %192 = vsyncadd [#allocation4], 4294967280 }
 0x117   :  { %128 = vsyncpa [#allocation3], 1 }
 0x118   :  { %129 = vsyncpa [#allocation4], 1 }

</bundles_post_ra>
